<compile_context>
chip_gen: v6e
topology: v6e:2x2x1
jax: 0.10.0
libtpu: 0.0.40
codegen_flags: <defaults>
</compile_context>

<pallas_src>
import functools

import jax
import jax.numpy as jnp
from jax.experimental import pallas as pl
from jax.experimental.pallas import tpu as pltpu

BN_EPS = 1e-5


# ---------------------------------------------------------------------------
# Stage 1: AdaptiveAvgPool2d((1,1)) + fc0 (no bias), pipelined over N.
# ---------------------------------------------------------------------------
def _pool_fc0_kernel(x_ref, w0_ref, h_ref, *, inv_s):
    # x_ref: (tile_N, S, C) bf16   w0_ref: (C, hid) bf16   h_ref: (tile_N, hid) f32
    x = x_ref[...]
    # Spatial pool: sublane reduction, accumulated in f32.
    pooled = jnp.sum(x, axis=1, dtype=jnp.float32) * inv_s          # (tile_N, C)
    # fc0 on the MXU: bf16 operands, f32 accumulation.
    h_ref[...] = jnp.dot(pooled.astype(jnp.bfloat16), w0_ref[...],
                         preferred_element_type=jnp.float32)


# ---------------------------------------------------------------------------
# Stage 2: BN0 (batch stats) -> ReLU -> fc1 (no bias) -> BN1 (batch stats).
# Runs once on the small (N, hid) activations so statistics are batch-global.
# ---------------------------------------------------------------------------
def _bn_relu_fc1_bn_kernel(h_ref, g0_ref, b0_ref, w1_ref, g1_ref, b1_ref,
                           out_ref, *, inv_n):
    h = h_ref[...]                                                   # (N, hid) f32

    # BN0: one-pass training-mode batch statistics (biased var), f32 math.
    mu0 = jnp.sum(h, axis=0, keepdims=True) * inv_n
    ex0 = jnp.sum(h * h, axis=0, keepdims=True) * inv_n
    var0 = jnp.maximum(ex0 - mu0 * mu0, 0.0)
    h = (h - mu0) * jax.lax.rsqrt(var0 + BN_EPS) * g0_ref[...] + b0_ref[...]

    # ReLU
    h = jnp.maximum(h, 0.0)

    # fc1 on the MXU: bf16 operands, f32 accumulation.
    y = jnp.dot(h.astype(jnp.bfloat16), w1_ref[...],
                preferred_element_type=jnp.float32)                  # (N, out)

    # BN1
    mu1 = jnp.sum(y, axis=0, keepdims=True) * inv_n
    ex1 = jnp.sum(y * y, axis=0, keepdims=True) * inv_n
    var1 = jnp.maximum(ex1 - mu1 * mu1, 0.0)
    out_ref[...] = (y - mu1) * jax.lax.rsqrt(var1 + BN_EPS) * g1_ref[...] + b1_ref[...]


# ---------------------------------------------------------------------------
# Params: _init_weights(init_linear='normal'): Linear ~ N(0, 0.01), BN w=1, b=0.
# Linear weights stored pre-transposed as (in, out) in bf16 for the MXU.
# ---------------------------------------------------------------------------
def init_params(key, in_channels, hid_channels, out_channels, std=0.01):
    k0, k1 = jax.random.split(key)
    w0 = (std * jax.random.normal(k0, (in_channels, hid_channels), jnp.float32)
          ).astype(jnp.bfloat16)
    w1 = (std * jax.random.normal(k1, (hid_channels, out_channels), jnp.float32)
          ).astype(jnp.bfloat16)
    g0 = jnp.ones((1, hid_channels), jnp.float32)
    b0 = jnp.zeros((1, hid_channels), jnp.float32)
    g1 = jnp.ones((1, out_channels), jnp.float32)
    b1 = jnp.zeros((1, out_channels), jnp.float32)
    return (w0, g0, b0, w1, g1, b1)


def _choose_tile_n(n, s, c, itemsize=2, budget_bytes=24 << 20):
    """Largest divisor of n whose double-buffered (tile_N, S, C) bf16 block fits
    the per-input VMEM budget (sized for v7x's 64 MiB; v5e/v6e have headroom)."""
    per_row = 2 * s * c * itemsize  # x2 for double-buffering
    tile = max(1, min(n, budget_bytes // max(per_row, 1)))
    while n % tile:
        tile -= 1
    return tile


def nonlinear_neck_simsiam(feats, params):
    """feats: tuple/list of NCHW feature maps (selects feats[3] if len==4 else feats[0])."""
    x = feats[3] if len(feats) == 4 else feats[0]
    n, c, hgt, wid = x.shape
    s = hgt * wid

    w0, g0, b0, w1, g1, b1 = params
    hid = w0.shape[1]
    out_c = w1.shape[1]

    # Channel-last, bf16 on the wire: (N, S, C) -> C on the 128-lane axis.
    x_nsc = jnp.transpose(x.reshape(n, c, s), (0, 2, 1)).astype(jnp.bfloat16)

    tile_n = _choose_tile_n(n, s, c)
    grid = (n // tile_n,)

    # Explicit VMEM budget: double-buffered x blocks + resident bf16 W0 +
    # double-buffered f32 h blocks + headroom. Clamp for v7x's 64 MiB physical.
    vmem1 = (2 * tile_n * s * c * 2 + c * hid * 2 + 2 * tile_n * hid * 4 + (4 << 20))
    vmem1 = int(min(max(vmem1, 32 << 20), 60 << 20))

    h = pl.pallas_call(
        functools.partial(_pool_fc0_kernel, inv_s=1.0 / s),
        out_shape=jax.ShapeDtypeStruct((n, hid), jnp.float32),
        grid_spec=pltpu.PrefetchScalarGridSpec(
            num_scalar_prefetch=0,
            grid=grid,
            in_specs=[
                pl.BlockSpec((tile_n, s, c), lambda i: (i, 0, 0)),
                pl.BlockSpec((c, hid), lambda i: (0, 0)),   # resident weight
            ],
            out_specs=pl.BlockSpec((tile_n, hid), lambda i: (i, 0)),
        ),
        compiler_params=pltpu.CompilerParams(
            dimension_semantics=("parallel",),
            vmem_limit_bytes=vmem1,
        ),
        cost_estimate=pl.CostEstimate(
            flops=int(n * s * c + 2 * n * c * hid),
            transcendentals=0,
            bytes_accessed=int(n * s * c * 2 + c * hid * 2 + n * hid * 4),
        ),
    )(x_nsc, w0)

    # Stage 2: small (N, hid)/(N, out) tensors -> single un-gridded kernel so the
    # BatchNorm statistics stay batch-global.
    vmem2 = int(n * hid * 4 + hid * out_c * 2 + 2 * n * out_c * 4 + (8 << 20))
    vmem2 = int(min(max(vmem2, 32 << 20), 60 << 20))
    vmem_spec = pl.BlockSpec(memory_space=pltpu.MemorySpace.VMEM)

    out = pl.pallas_call(
        functools.partial(_bn_relu_fc1_bn_kernel, inv_n=1.0 / n),
        out_shape=jax.ShapeDtypeStruct((n, out_c), jnp.float32),
        in_specs=[vmem_spec] * 6,
        out_specs=vmem_spec,
        compiler_params=pltpu.CompilerParams(vmem_limit_bytes=vmem2),
        cost_estimate=pl.CostEstimate(
            flops=int(2 * n * hid * out_c + 10 * n * (hid + out_c)),
            transcendentals=int(hid + out_c),
            bytes_accessed=int(n * hid * 4 + hid * out_c * 2 + n * out_c * 4
                               + 2 * (hid + out_c) * 4),
        ),
    )(h, g0, b0, w1, g1, b1)
    # TODO(synk): SyncBatchNorm's cross-device all-reduce of batch statistics and
    # running_mean/var updates are not represented (per-device training stats only).
    return [out]


if __name__ == "__main__":
    # Small shapes consistent with the module's forward.
    N, C, H, W = 2, 4, 16, 16
    HID, OUT = 32, 16

    key = jax.random.PRNGKey(0)
    k_x, k_p = jax.random.split(key)

    # Simulate a backbone returning 4 feature maps; forward picks index 3.
    feats = [
        jax.random.normal(jax.random.fold_in(k_x, i), (N, C, H, W), jnp.float32)
        for i in range(4)
    ]
    params = init_params(k_p, C, HID, OUT)

    result = nonlinear_neck_simsiam(feats, params)
    jax.block_until_ready(result[0])
    assert result[0].shape == (N, OUT)
    assert bool(jnp.all(jnp.isfinite(result[0])))
    print("KERNEL_OK")
</pallas_src>

<mosaic_0001>
module attributes {stable_mosaic.version = 11 : i64} {
  func.func @_pool_fc0_kernel(%arg0: i32, %arg1: memref<2x256x4xbf16, #tpu.memory_space<vmem>>, %arg2: memref<4x32xbf16, #tpu.memory_space<vmem>>, %arg3: memref<2x32xf32, #tpu.memory_space<vmem>>) attributes {dimension_semantics = [#tpu.dimension_semantics<parallel>], iteration_bounds = array<i64: 1>, scalar_prefetch = 0 : i64, scratch_operands = 0 : i64, tpu.core_type = #tpu.core_type<tc>, window_params = [{transform_indices = @transform_0, window_bounds = array<i64: 2, 256, 4>}, {pipeline_mode = #tpu.pipeline_mode<synchronous>, transform_indices = @transform_1, window_bounds = array<i64: 4, 32>}, {transform_indices = @transform_2, window_bounds = array<i64: 2, 32>}]} {
    %c0 = arith.constant 0 : index
    %c0_0 = arith.constant 0 : index
    %c0_1 = arith.constant 0 : index
    %0 = vector.load %arg1[%c0, %c0_0, %c0_1] : memref<2x256x4xbf16, #tpu.memory_space<vmem>>, vector<2x256x4xbf16>
    %1 = arith.extf %0 : vector<2x256x4xbf16> to vector<2x256x4xf32>
    %cst = arith.constant dense<0.000000e+00> : vector<2x4xf32>
    %2 = vector.multi_reduction <add>, %1, %cst [1] : vector<2x256x4xf32> to vector<2x4xf32>
    %cst_2 = arith.constant 3.906250e-03 : f32
    %3 = vector.broadcast %cst_2 : f32 to vector<2x4xf32>
    %4 = arith.mulf %2, %3 : vector<2x4xf32>
    %5 = arith.truncf %4 : vector<2x4xf32> to vector<2x4xbf16>
    %c0_3 = arith.constant 0 : index
    %c0_4 = arith.constant 0 : index
    %6 = vector.load %arg2[%c0_3, %c0_4] : memref<4x32xbf16, #tpu.memory_space<vmem>>, vector<4x32xbf16>
    %cst_5 = arith.constant dense<0.000000e+00> : vector<2x32xf32>
    %7 = tpu.matmul %5, %6, %cst_5 {dimension_numbers = #tpu.dot_dimension_numbers<[1], [0], [0], [1], [0, 0, 1, 1], [], []>} : vector<2x4xbf16>, vector<4x32xbf16>, vector<2x32xf32> -> vector<2x32xf32>
    %c0_6 = arith.constant 0 : index
    %c0_7 = arith.constant 0 : index
    %8 = vector.load %arg3[%c0_6, %c0_7] : memref<2x32xf32, #tpu.memory_space<vmem>>, vector<2x32xf32>
    tpu.vector_store %arg3[%c0_6, %c0_7], %7 {strides = array<i32>} : memref<2x32xf32, #tpu.memory_space<vmem>>, vector<2x32xf32>,
    return
  }
  func.func @transform_0(%arg0: i32) -> (i32, i32, i32) {
    %c0_i32 = arith.constant 0 : i32
    %c0_i32_0 = arith.constant 0 : i32
    %c0_i32_1 = arith.constant 0 : i32
    return %arg0, %c0_i32, %c0_i32_0 : i32, i32, i32
  }
  func.func @transform_1(%arg0: i32) -> (i32, i32) {
    %c0_i32 = arith.constant 0 : i32
    %c0_i32_0 = arith.constant 0 : i32
    %c0_i32_1 = arith.constant 0 : i32
    return %c0_i32, %c0_i32_0 : i32, i32
  }
  func.func @transform_2(%arg0: i32) -> (i32, i32) {
    %c0_i32 = arith.constant 0 : i32
    %c0_i32_0 = arith.constant 0 : i32
    return %arg0, %c0_i32 : i32, i32
  }
}

</mosaic_0001>

<bundles_post_ra>
// kernel: tpu_custom_call.1
= control target key start
LH: loop header
LB: loop body
LE: loop exit
PB: predicated region body
PF: predicated region fallthrough
CT: control target
= control target key end

     0   :  { %vm295_vm0 = vcmask 1041408   ;;  %v548_v1 = vmov 0.0   ;;  %vm549_vm1 = vmmov 0   ;;  %s733_s0 = inlined_call_operand.vmem [shape: bf16[2,256,4], index: 0, kind: input, shape index: {}]   ;;  %s734_s1 = inlined_call_operand.vmem [shape: bf16[4,32], index: 1, kind: input, shape index: {}]   ;;  %s735_s2 = inlined_call_operand.hbm [shape: f32[2,32], index: 2, kind: output, shape index: {}]  }
   0x1   :  { %v284_v0 = vld [vmem:[%s734_s1] sm:$0x3]  ;;  %517 = vmatprep.subr.bf16.mxu0 %v548_v1  ;;  %519 = vmatprep.mubr.msk.bf16.mxu0 %vm549_vm1, %v548_v1  ;;  %v484_v4 = vld [vmem:[%s733_s0 + $0x8] sm:$0xff]  }
   0x2   :  { %v297_v2 = vsel %vm295_vm0, %v284_v0, 0  ;;  %v357_v3 = vld [vmem:[%s733_s0] sm:$0xff]  }
   0x3   :  { %518 = vmatpush3.bf16.msra.mxu0 %v297_v2 }
   0x4   :  { %7 = vsyncpa [#allocation3], 0  ;;  %v358_v5 = vunpack.c.l.bf16 %v357_v3  ;;  %v359_v6 = vunpack.c.h.bf16 %v357_v3  ;;  %v362_v7 = vunpack.c.l.bf16 %v484_v4  ;;  %v485_v8 = vld [vmem:[%s733_s0 + $0x10] sm:$0xff]   ;;  %vm141_vm2 = vcmask 31744   ;;  %v486_v13 = vld [vmem:[%s733_s0 + $0x18] sm:$0xff]  }
   0x5   :  { %v363_v9 = vunpack.c.h.bf16 %v484_v4  ;;  %v366_v10 = vunpack.c.l.bf16 %v485_v8  ;;  %v367_v16 = vunpack.c.h.bf16 %v485_v8  ;;  %v499_v17 = vld [vmem:[%s733_s0 + $0x80] sm:$0xff]   ;;  %v500_v19 = vld [vmem:[%s733_s0 + $0x88] sm:$0xff]   ;;  %v370_v21 = vunpack.c.l.bf16 %v486_v13  ;;  %v501_v30 = vld [vmem:[%s733_s0 + $0x90] sm:$0xff]  }
   0x6   :  { %v142_v11 = vsel %vm141_vm2, %v358_v5, 0.0  ;;  %v143_v12 = vsel %vm141_vm2, %v359_v6, 0.0  ;;  %v145_v15 = vsel %vm141_vm2, %v362_v7, 0.0  ;;  %v487_v23 = vld [vmem:[%s733_s0 + $0x20] sm:$0xff]   ;;  %v422_v24 = vunpack.c.l.bf16 %v499_v17  ;;  %v488_v36 = vld [vmem:[%s733_s0 + $0x28] sm:$0xff]   ;;  %v502_v43 = vld [vmem:[%s733_s0 + $0x98] sm:$0xff]  }
   0x7   :  { %v144_v14 = vadd.f32 %v143_v12, %v142_v11  ;;  %v147_v18 = vsel %vm141_vm2, %v363_v9, 0.0  ;;  %v149_v22 = vsel %vm141_vm2, %v366_v10, 0.0  ;;  %v371_v26 = vunpack.c.h.bf16 %v486_v13  ;;  %v489_v50 = vld [vmem:[%s733_s0 + $0x30] sm:$0xff]   ;;  %v503_v57 = vld [vmem:[%s733_s0 + $0xa0] sm:$0xff]   ;;  %v490_v0 = vld [vmem:[%s733_s0 + $0x38] sm:$0xff]  }
   0x8   :  { %v423_v27 = vunpack.c.h.bf16 %v499_v17  ;;  %v426_v28 = vunpack.c.l.bf16 %v500_v19  ;;  %v151_v29 = vsel %vm141_vm2, %v367_v16, 0.0  ;;  %v374_v32 = vunpack.c.l.bf16 %v487_v23  ;;  %v504_v7 = vld [vmem:[%s733_s0 + $0xa8] sm:$0xff]  }
   0x9   :  { %v146_v20 = vadd.f32 %v145_v15, %v144_v14  ;;  %v427_v33 = vunpack.c.h.bf16 %v500_v19  ;;  %v153_v34 = vsel %vm141_vm2, %v370_v21, 0.0  ;;  %v375_v35 = vunpack.c.h.bf16 %v487_v23  ;;  %v491_v14 = vld [vmem:[%s733_s0 + $0x40] sm:$0xff]   ;;  %v505_v21 = vld [vmem:[%s733_s0 + $0xb0] sm:$0xff]  }
   0xa   :  { %v211_v38 = vsel %vm141_vm2, %v422_v24, 0.0  ;;  %v430_v39 = vunpack.c.l.bf16 %v501_v30  ;;  %v155_v40 = vsel %vm141_vm2, %v371_v26, 0.0  ;;  %v212_v41 = vsel %vm141_vm2, %v423_v27, 0.0 }
   0xb   :  { %v148_v25 = vadd.f32 %v147_v18, %v146_v20  ;;  %v214_v42 = vsel %vm141_vm2, %v426_v28, 0.0  ;;  %v213_v45 = vadd.f32 %v212_v41, %v211_v38  ;;  %v378_v46 = vunpack.c.l.bf16 %v488_v36  ;;  %v492_v28 = vld [vmem:[%s733_s0 + $0x48] sm:$0xff]  }
   0xc   :  { %v431_v47 = vunpack.c.h.bf16 %v501_v30  ;;  %v157_v48 = vsel %vm141_vm2, %v374_v32, 0.0  ;;  %v216_v49 = vsel %vm141_vm2, %v427_v33, 0.0  ;;  %v379_v53 = vunpack.c.h.bf16 %v488_v36 }
   0xd   :  { %v150_v31 = vadd.f32 %v149_v22, %v148_v25  ;;  %v215_v52 = vadd.f32 %v214_v42, %v213_v45  ;;  %v434_v54 = vunpack.c.l.bf16 %v502_v43  ;;  %v159_v55 = vsel %vm141_vm2, %v375_v35, 0.0  ;;  %v506_v35 = vld [vmem:[%s733_s0 + $0xb8] sm:$0xff]   ;;  %v493_v42 = vld [vmem:[%s733_s0 + $0x50] sm:$0xff]  }
   0xe   :  { %v218_v56 = vsel %vm141_vm2, %v430_v39, 0.0  ;;  %v382_v60 = vunpack.c.l.bf16 %v489_v50  ;;  %v435_v61 = vunpack.c.h.bf16 %v502_v43  ;;  %v161_v62 = vsel %vm141_vm2, %v378_v46, 0.0 }
   0xf   :  { %v152_v37 = vadd.f32 %v151_v29, %v150_v31  ;;  %v217_v59 = vadd.f32 %v216_v49, %v215_v52  ;;  %v220_v63 = vsel %vm141_vm2, %v431_v47, 0.0  ;;  %v383_v3 = vunpack.c.h.bf16 %v489_v50  ;;  %v507_v49 = vld [vmem:[%s733_s0 + $0xc0] sm:$0xff]  }
  0x10   :  { %v438_v4 = vunpack.c.l.bf16 %v503_v57  ;;  %v163_v5 = vsel %vm141_vm2, %v379_v53, 0.0  ;;  %v222_v6 = vsel %vm141_vm2, %v434_v54, 0.0  ;;  %v386_v10 = vunpack.c.l.bf16 %v490_v0 }
  0x11   :  { %v154_v44 = vadd.f32 %v153_v34, %v152_v37  ;;  %v219_v2 = vadd.f32 %v218_v56, %v217_v59  ;;  %v439_v11 = vunpack.c.h.bf16 %v503_v57  ;;  %v165_v12 = vsel %vm141_vm2, %v382_v60, 0.0  ;;  %v494_v56 = vld [vmem:[%s733_s0 + $0x58] sm:$0xff]  }
  0x12   :  { %v224_v13 = vsel %vm141_vm2, %v435_v61, 0.0  ;;  %v387_v17 = vunpack.c.h.bf16 %v490_v0  ;;  %v442_v18 = vunpack.c.l.bf16 %v504_v7  ;;  %v167_v19 = vsel %vm141_vm2, %v383_v3, 0.0 }
  0x13   :  { %v156_v51 = vadd.f32 %v155_v40, %v154_v44  ;;  %v221_v9 = vadd.f32 %v220_v63, %v219_v2  ;;  %v226_v20 = vsel %vm141_vm2, %v438_v4, 0.0  ;;  %v390_v24 = vunpack.c.l.bf16 %v491_v14  ;;  %v508_v63 = vld [vmem:[%s733_s0 + $0xc8] sm:$0xff]  }
  0x14   :  { %v443_v25 = vunpack.c.h.bf16 %v504_v7  ;;  %v169_v26 = vsel %vm141_vm2, %v386_v10, 0.0  ;;  %v228_v27 = vsel %vm141_vm2, %v439_v11, 0.0  ;;  %v391_v31 = vunpack.c.h.bf16 %v491_v14 }
  0x15   :  { %v158_v58 = vadd.f32 %v157_v48, %v156_v51  ;;  %v223_v16 = vadd.f32 %v222_v6, %v221_v9  ;;  %v446_v32 = vunpack.c.l.bf16 %v505_v21  ;;  %v171_v33 = vsel %vm141_vm2, %v387_v17, 0.0  ;;  %v495_v6 = vld [vmem:[%s733_s0 + $0x60] sm:$0xff]  }
  0x16   :  { %v230_v34 = vsel %vm141_vm2, %v442_v18, 0.0  ;;  %v394_v38 = vunpack.c.l.bf16 %v492_v28  ;;  %v447_v39 = vunpack.c.h.bf16 %v505_v21  ;;  %v173_v40 = vsel %vm141_vm2, %v390_v24, 0.0 }
  0x17   :  { %v160_v1 = vadd.f32 %v159_v55, %v158_v58  ;;  %v225_v23 = vadd.f32 %v224_v13, %v223_v16  ;;  %v232_v41 = vsel %vm141_vm2, %v443_v25, 0.0  ;;  %v395_v45 = vunpack.c.h.bf16 %v492_v28  ;;  %v509_v13 = vld [vmem:[%s733_s0 + $0xd0] sm:$0xff]  }
  0x18   :  { %v450_v46 = vunpack.c.l.bf16 %v506_v35  ;;  %v175_v47 = vsel %vm141_vm2, %v391_v31, 0.0  ;;  %v234_v48 = vsel %vm141_vm2, %v446_v32, 0.0  ;;  %v398_v52 = vunpack.c.l.bf16 %v493_v42 }
  0x19   :  { %v162_v8 = vadd.f32 %v161_v62, %v160_v1  ;;  %v227_v30 = vadd.f32 %v226_v20, %v225_v23  ;;  %v451_v53 = vunpack.c.h.bf16 %v506_v35  ;;  %v177_v54 = vsel %vm141_vm2, %v394_v38, 0.0  ;;  %v496_v20 = vld [vmem:[%s733_s0 + $0x68] sm:$0xff]  }
  0x1a   :  { %v236_v55 = vsel %vm141_vm2, %v447_v39, 0.0  ;;  %v399_v59 = vunpack.c.h.bf16 %v493_v42  ;;  %v454_v60 = vunpack.c.l.bf16 %v507_v49  ;;  %v179_v61 = vsel %vm141_vm2, %v395_v45, 0.0 }
  0x1b   :  { %v164_v15 = vadd.f32 %v163_v5, %v162_v8  ;;  %v229_v37 = vadd.f32 %v228_v27, %v227_v30  ;;  %v238_v62 = vsel %vm141_vm2, %v450_v46, 0.0  ;;  %v402_v2 = vunpack.c.l.bf16 %v494_v56  ;;  %v510_v27 = vld [vmem:[%s733_s0 + $0xd8] sm:$0xff]  }
  0x1c   :  { %v455_v3 = vunpack.c.h.bf16 %v507_v49  ;;  %v181_v4 = vsel %vm141_vm2, %v398_v52, 0.0  ;;  %v240_v5 = vsel %vm141_vm2, %v451_v53, 0.0  ;;  %v403_v9 = vunpack.c.h.bf16 %v494_v56 }
  0x1d   :  { %v166_v22 = vadd.f32 %v165_v12, %v164_v15  ;;  %v231_v44 = vadd.f32 %v230_v34, %v229_v37  ;;  %v458_v10 = vunpack.c.l.bf16 %v508_v63  ;;  %v183_v11 = vsel %vm141_vm2, %v399_v59, 0.0  ;;  %v497_v34 = vld [vmem:[%s733_s0 + $0x70] sm:$0xff]  }
  0x1e   :  { %v242_v12 = vsel %vm141_vm2, %v454_v60, 0.0  ;;  %v406_v16 = vunpack.c.l.bf16 %v495_v6  ;;  %v459_v17 = vunpack.c.h.bf16 %v508_v63  ;;  %v185_v18 = vsel %vm141_vm2, %v402_v2, 0.0 }
  0x1f   :  { %v168_v29 = vadd.f32 %v167_v19, %v166_v22  ;;  %v233_v51 = vadd.f32 %v232_v41, %v231_v44  ;;  %v244_v19 = vsel %vm141_vm2, %v455_v3, 0.0  ;;  %v407_v23 = vunpack.c.h.bf16 %v495_v6  ;;  %v511_v41 = vld [vmem:[%s733_s0 + $0xe0] sm:$0xff]  }
  0x20   :  { %v462_v24 = vunpack.c.l.bf16 %v509_v13  ;;  %v187_v25 = vsel %vm141_vm2, %v403_v9, 0.0  ;;  %v410_v30 = vunpack.c.l.bf16 %v496_v20  ;;  %v463_v31 = vunpack.c.h.bf16 %v509_v13 }
  0x21   :  { %v170_v36 = vadd.f32 %v169_v26, %v168_v29  ;;  %v235_v58 = vadd.f32 %v234_v48, %v233_v51  ;;  %v246_v26 = vsel %vm141_vm2, %v458_v10, 0.0  ;;  %v189_v32 = vsel %vm141_vm2, %v406_v16, 0.0  ;;  %v498_v48 = vld [vmem:[%s733_s0 + $0x78] sm:$0xff]  }
  0x22   :  { %v411_v37 = vunpack.c.h.bf16 %v496_v20  ;;  %v466_v38 = vunpack.c.l.bf16 %v510_v27  ;;  %v191_v39 = vsel %vm141_vm2, %v407_v23, 0.0  ;;  %v414_v44 = vunpack.c.l.bf16 %v497_v34 }
  0x23   :  { %v172_v43 = vadd.f32 %v171_v33, %v170_v36  ;;  %v237_v1 = vadd.f32 %v236_v55, %v235_v58  ;;  %v248_v33 = vsel %vm141_vm2, %v459_v17, 0.0  ;;  %v467_v45 = vunpack.c.h.bf16 %v510_v27  ;;  %v512_v55 = vld [vmem:[%s733_s0 + $0xe8] sm:$0xff]  }
  0x24   :  { %v193_v46 = vsel %vm141_vm2, %v410_v30, 0.0  ;;  %v415_v51 = vunpack.c.h.bf16 %v497_v34  ;;  %v470_v52 = vunpack.c.l.bf16 %v511_v41  ;;  %v195_v53 = vsel %vm141_vm2, %v411_v37, 0.0 }
  0x25   :  { %v174_v50 = vadd.f32 %v173_v40, %v172_v43  ;;  %v239_v8 = vadd.f32 %v238_v62, %v237_v1  ;;  %v250_v40 = vsel %vm141_vm2, %v462_v24, 0.0  ;;  %v418_v58 = vunpack.c.l.bf16 %v498_v48 }
  0x26   :  { %v471_v59 = vunpack.c.h.bf16 %v511_v41  ;;  %v197_v60 = vsel %vm141_vm2, %v414_v44, 0.0  ;;  %v474_v1 = vunpack.c.l.bf16 %v512_v55  ;;  %v199_v2 = vsel %vm141_vm2, %v415_v51, 0.0 }
  0x27   :  { %v176_v57 = vadd.f32 %v175_v47, %v174_v50  ;;  %v241_v15 = vadd.f32 %v240_v5, %v239_v8  ;;  %v252_v47 = vsel %vm141_vm2, %v463_v31, 0.0  ;;  %v258_v3 = vsel %vm141_vm2, %v470_v52, 0.0 }
  0x28   :  { %v201_v8 = vsel %vm141_vm2, %v418_v58, 0.0  ;;  %v260_v9 = vsel %vm141_vm2, %v471_v59, 0.0  ;;  %vm289_vm3 = vcmask 1041409   ;;  %vm339_vm4 = vcmask 254976  }
  0x29   :  { %v178_v0 = vadd.f32 %v177_v54, %v176_v57  ;;  %v243_v22 = vadd.f32 %v242_v12, %v241_v15  ;;  %v254_v54 = vsel %vm141_vm2, %v466_v38, 0.0  ;;  %v514_v15 = vld [vmem:[%s733_s0 + $0xf8] sm:$0xff]  }
  0x2b   :  { %v180_v7 = vadd.f32 %v179_v61, %v178_v0  ;;  %v245_v29 = vadd.f32 %v244_v19, %v243_v22  ;;  %v256_v61 = vsel %vm141_vm2, %v467_v45, 0.0  ;;  %v419_v0 = vunpack.c.h.bf16 %v498_v48 }
  0x2c   :  { %v482_v22 = vunpack.c.l.bf16 %v514_v15 }
  0x2d   :  { %v182_v14 = vadd.f32 %v181_v4, %v180_v7  ;;  %v247_v36 = vadd.f32 %v246_v26, %v245_v29  ;;  %v513_v4 = vld [vmem:[%s733_s0 + $0xf0] sm:$0xff]   ;;  %v475_v7 = vunpack.c.h.bf16 %v512_v55  ;;  %v203_v13 = vsel %vm141_vm2, %v419_v0, 0.0  ;;  %s550_s0 = smov [#allocation2]  }
  0x2e   :  { %v478_v12 = vunpack.c.l.bf16 %v513_v4  ;;  %v483_v26 = vunpack.c.h.bf16 %v514_v15  ;;  %v270_v30 = vsel %vm141_vm2, %v482_v22, 0.0  ;;  %s347_s16 = sshll.u32 %s550_s0, 4  ;;  %s348_s16 = int_to_ptr.vmem [resolvable:$true] %s347_s16 }
  0x2f   :  { %v184_v21 = vadd.f32 %v183_v11, %v182_v14  ;;  %v249_v43 = vadd.f32 %v248_v33, %v247_v36  ;;  %v262_v14 = vsel %vm141_vm2, %v474_v1, 0.0  ;;  %v264_v19 = vsel %vm141_vm2, %v475_v7, 0.0  ;;  %s526_s17 = scalar_lea.vmem %s348_s16, 32  ;;  %p531_p1 = scmp.lt.s32.totalorder %s348_s16, %s348_s16 }
  0x30   :  { %v266_v23 = vsel %vm141_vm2, %v478_v12, 0.0  ;;  %v272_v33 = vsel %vm141_vm2, %v483_v26, 0.0  ;;  %p527_p0 = scmp.ne.s32.totalorder %s348_s16, %s526_s17  ;;  %p532_p2 = scmp.lt.s32.totalorder %s526_s17, %s526_s17 }
  0x31   :  { %v186_v28 = vadd.f32 %v185_v18, %v184_v21  ;;  %v251_v50 = vadd.f32 %v250_v40, %v249_v43  ;;  %v479_v18 = vunpack.c.h.bf16 %v513_v4 }
  0x32   :  { %p533_p3 = por %p532_p2, %p531_p1 }
  0x33   :  { %v188_v35 = vadd.f32 %v187_v25, %v186_v28  ;;  %v253_v57 = vadd.f32 %v252_v47, %v251_v50  ;;  %v268_v27 = vsel %vm141_vm2, %v479_v18, 0.0 }
  0x34   :  { %p534_p4 = pnand %p533_p3, %p527_p0 }
  0x35   :  { %v190_v42 = vadd.f32 %v189_v32, %v188_v35  ;;  %v255_v63 = vadd.f32 %v254_v54, %v253_v57 }
  0x37   :  { %v192_v49 = vadd.f32 %v191_v39, %v190_v42  ;;  %v257_v6 = vadd.f32 %v256_v61, %v255_v63 }
  0x39   :  { %v194_v56 = vadd.f32 %v193_v46, %v192_v49  ;;  %v259_v11 = vadd.f32 %v258_v3, %v257_v6 }
  0x3b   :  { %v196_v62 = vadd.f32 %v195_v53, %v194_v56  ;;  %v261_v17 = vadd.f32 %v260_v9, %v259_v11 }
  0x3d   :  { %v198_v5 = vadd.f32 %v197_v60, %v196_v62  ;;  %v263_v21 = vadd.f32 %v262_v14, %v261_v17 }
  0x3f   :  { %v200_v10 = vadd.f32 %v199_v2, %v198_v5  ;;  %v265_v25 = vadd.f32 %v264_v19, %v263_v21 }
  0x41   :  { %v202_v16 = vadd.f32 %v201_v8, %v200_v10  ;;  %v267_v29 = vadd.f32 %v266_v23, %v265_v25 }
  0x43   :  { %v204_v20 = vadd.f32 %v203_v13, %v202_v16  ;;  %v269_v32 = vadd.f32 %v268_v27, %v267_v29 }
  0x45   :  { %v205_v24 = vrot.slane %v204_v20, 4  ;;  %v271_v35 = vadd.f32 %v270_v30, %v269_v32 }
  0x47   :  { %v206_v28 = vadd.f32 %v205_v24, %v204_v20  ;;  %v273_v37 = vadd.f32 %v272_v33, %v271_v35 }
  0x49   :  { %v207_v31 = vrot.slane %v206_v28, 2  ;;  %v274_v38 = vrot.slane %v273_v37, 4 }
  0x4b   :  { %v208_v34 = vadd.f32 %v207_v31, %v206_v28  ;;  %v275_v40 = vadd.f32 %v274_v38, %v273_v37 }
  0x4d   :  { %v209_v36 = vrot.slane %v208_v34, 1  ;;  %v276_v41 = vrot.slane %v275_v40, 2 }
  0x4f   :  { %v210_v39 = vadd.f32 %v209_v36, %v208_v34  ;;  %v277_v42 = vadd.f32 %v276_v41, %v275_v40 }
  0x51   :  { %v280_v43 = vmul.f32 0.00390625, %v210_v39  ;;  %v278_v44 = vrot.slane %v277_v42, 1 }
  0x53   :  { %v279_v45 = vadd.f32 %v278_v44, %v277_v42  ;;  %v282_v46 = vpack.c.bf16 %v280_v43, %v280_v43 }
  0x55   :  { %v281_v47 = vmul.f32 0.00390625, %v279_v45  ;;  %v287_v49 = vunpack.c.l.b16 %v282_v46 }
  0x57   :  { %v283_v48 = vpack.c.bf16 %v281_v47, %v281_v47 }
  0x59   :  { %v288_v50 = vunpack.c.l.b16 %v283_v48 }
  0x5b   :  { %v290_v51 = vsel %vm289_vm3, %v288_v50, %v287_v49 }
  0x5c   :  { %v291_v52 = vpack.c.b16 %v290_v51, %v290_v51 }
  0x5e   :  { %520 = vmatmul.mubr.msk.bf16.vlgmr.msra.gmra.mxu0 %vm141_vm2, %v291_v52 }
 0x11e   :  { %v333_v53 = vpop.f32.mrf.mxu0 }
 0x11f   :  { %340 = vst.msk [vmem:[#allocation2] sm:$0x3] %vm339_vm4, %v333_v53 }
 0x120   :  { %v521_v54 = vpop.f32.mrf.mxu0 }
 0x121   :  { %537 = shalt.err (!%p534_p4)
}
 0x122   :  { %350 = dma.vmem_to_hbm [thread:$0]  %s348_s16, 32, %s735_s2, [#allocation3]   ;;  %v336_v55 = vpop.f32.mrf.mxu0 }
 0x124   :  { %v522_v56 = vpop.f32.mrf.mxu0 }
 0x125   :  { %546 = dma.done.wait [#allocation3], 32  }
 0x126   :  { %547 = vsyncadd [#allocation3], 4294967264 }
 0x127   :  { %354 = vsyncpa [#allocation3], 1 }

</bundles_post_ra>
